<compile_context>
chip_gen: v7x
topology: tpu7x:2x2x1
jax: 0.10.0
libtpu: 0.0.40
codegen_flags: <defaults>
</compile_context>

<pallas_src>
import functools
import math
from typing import NamedTuple

import jax
import jax.numpy as jnp
from jax.experimental import pallas as pl
from jax.experimental.pallas import tpu as pltpu


_MIN_PAR_STEPS = 8                    # target steps on the parallel grid axes
_MIN_SPLIT_BYTES = 2 * 1024 * 1024    # only force extra splitting above this size


class _HW(NamedTuple):
    vmem_bytes: int
    block_budget: int
    hard_cap: int
    small_input_bytes: int


@functools.lru_cache(maxsize=1)
def _hw() -> _HW:
    """Generation-aware sizing (v5e/v6e: 128 MiB VMEM, v7x: 64 MiB)."""
    vmem = None
    try:
        info = pltpu.get_tpu_info()
        vmem = int(getattr(info, "vmem_capacity_bytes", 0)) or None
    except Exception:
        vmem = None
    kind = ""
    try:
        kind = jax.devices()[0].device_kind.lower()
    except Exception:
        pass
    looks_v7 = ("v7" in kind) or ("tpu7" in kind) or ("7x" in kind)
    if vmem is None:
        if looks_v7:
            vmem = 64 * 1024 * 1024
        elif ("v5" in kind) or ("v6" in kind):
            vmem = 128 * 1024 * 1024
        else:
            vmem = 64 * 1024 * 1024          # unknown generation: be conservative
    # Soft per-block budget: large blocks amortize the ~0.35us/step overhead on
    # fast HBM; smaller on v7x because it only has 64 MiB VMEM per TensorCore.
    block_budget = min(16 * 1024 * 1024, max(2 * 1024 * 1024, vmem // 8))
    # Hard cap on the whole kernel's VMEM footprint (double buffers + scratch),
    # consistent with vmem_limit_bytes and well under physical VMEM.
    hard_cap = min(vmem * 3 // 4, vmem - 8 * 1024 * 1024)
    # Faster HBM (v7x) moves the Pallas-vs-XLA crossover up.
    small_input = 1024 * 1024 if (looks_v7 or vmem <= 64 * 1024 * 1024) else 256 * 1024
    return _HW(vmem, block_budget, hard_cap, small_input)


# --------------------------------------------------------------------------
# Tiling helpers
# --------------------------------------------------------------------------
def _sublane_multiple(dtype):
    # Sub-32-bit dtypes pack along sublanes: (8,128) f32, (16,128) bf16, (32,128) int8.
    return max(8, 32 // max(1, jnp.dtype(dtype).itemsize))


def _largest_divisor(extent, limit, multiple_of):
    """Largest t <= limit with t % multiple_of == 0 and extent % t == 0, else None."""
    extent = int(extent)
    limit = int(min(limit, extent))
    start = (limit // multiple_of) * multiple_of
    for t in range(start, 0, -multiple_of):
        if extent % t == 0:
            return t
    return None


def _min_valid_tile(extent, sm):
    """Smallest tile satisfying the TPU block rule (multiple of 8 sublanes, or full)."""
    if extent % sm == 0:
        return sm
    if extent % 8 == 0:
        return 8
    return extent


def _aligned_tile(extent, limit, sm):
    """Largest constraint-valid tile <= limit; clamps to the smallest valid tile
    (never silently to the full extent) when nothing <= limit exists.  Whether
    the result actually fits VMEM is checked later against the hard cap."""
    if extent <= limit:
        return extent
    t = _largest_divisor(extent, limit, sm)
    if t is None and sm > 8:
        t = _largest_divisor(extent, limit, 8)
    return t if t is not None else _min_valid_tile(extent, sm)


def _maybe_buffered_spec(shape, index_map, nbuf):
    """Input BlockSpec with deeper pipelining when small blocks are streamed."""
    if nbuf and nbuf > 2 and hasattr(pl, "Buffered"):
        try:
            return pl.BlockSpec(shape, index_map, pipeline_mode=pl.Buffered(nbuf))
        except TypeError:
            pass
    return pl.BlockSpec(shape, index_map)


# --------------------------------------------------------------------------
# Kernels (f32 accumulation, f32 1/R scale, cast on store)
# --------------------------------------------------------------------------
def _mean_mid_full_r_kernel(inv_n, x_ref, o_ref):
    """x_ref: (to, R, ti) -> o_ref: (to, ti); whole reduced extent per block."""
    s = jnp.sum(x_ref[...].astype(jnp.float32), axis=1)
    o_ref[...] = (s * inv_n).astype(o_ref.dtype)


def _mean_mid_tiled_r_kernel(inv_n, x_ref, o_ref, acc_ref):
    """x_ref: (to, tr, ti); accumulate partial sums over the last grid axis."""
    k = pl.program_id(2)

    @pl.when(k == 0)
    def _():
        acc_ref[...] = jnp.zeros_like(acc_ref)

    acc_ref[...] += jnp.sum(x_ref[...].astype(jnp.float32), axis=1)

    @pl.when(k == pl.num_programs(2) - 1)
    def _():
        o_ref[...] = (acc_ref[...] * inv_n).astype(o_ref.dtype)


def _mean_last_full_r_kernel(inv_n, x_ref, o_ref):
    """x_ref: (tg, L, R) -> o_ref: (tg, L); lane-axis reduction, lane-dense output."""
    # TODO(synk): if a bundle profile ever shows the XLU slot binding here,
    # replace the lane reduction with a dot against a ones(R,) vector (MXU).
    s = jnp.sum(x_ref[...].astype(jnp.float32), axis=-1)
    o_ref[...] = (s * inv_n).astype(o_ref.dtype)


def _mean_last_tiled_r_kernel(inv_n, x_ref, o_ref, acc_ref):
    """x_ref: (tg, L, tr); accumulate partial lane-axis sums over the last grid axis."""
    k = pl.program_id(1)

    @pl.when(k == 0)
    def _():
        acc_ref[...] = jnp.zeros_like(acc_ref)

    acc_ref[...] += jnp.sum(x_ref[...].astype(jnp.float32), axis=-1)

    @pl.when(k == pl.num_programs(1) - 1)
    def _():
        o_ref[...] = (acc_ref[...] * inv_n).astype(o_ref.dtype)


# --------------------------------------------------------------------------
# Tiled pallas_call builders
# --------------------------------------------------------------------------
def _mean_middle_axis(x3, budget, hw):
    """Mean over the middle axis of x3 = (outer, R, inner). Returns (outer, inner) or None."""
    outer, R, inner = x3.shape
    dt = x3.dtype
    isz = dt.itemsize
    sm = _sublane_multiple(dt)

    tr_floor = _min_valid_tile(R, sm)
    to_floor = _min_valid_tile(outer, sm)

    # Lane tile (inner): spend budget on lane width first (wide, unmasked vst),
    # leaving room for one minimal sublane-aligned (to, tr) group.
    lane_cap = max(128, budget // (isz * tr_floor * min(to_floor, sm)))
    if inner <= lane_cap:
        ti = inner
    else:
        ti = _largest_divisor(inner, lane_cap, 128) or inner

    # Reduce tile: whole R per block when it fits (no accumulator needed),
    # else the largest aligned divisor within budget.
    row_cap = max(1, budget // (isz * ti * min(to_floor, sm)))
    tr = R if R <= row_cap else _aligned_tile(R, row_cap, sm)

    # Outer tile: fill the remaining budget.
    o_cap = max(1, budget // (isz * ti * tr))
    to = outer if outer <= o_cap else _aligned_tile(outer, o_cap, sm)

    # Guarantee enough parallel grid steps for DMA/compute overlap and v7x's
    # second TensorCore on medium inputs (avoid a single grid=(1,1) launch).
    total_bytes = outer * R * inner * isz
    if total_bytes >= _MIN_SPLIT_BYTES:
        min_block = max(32 * 1024, min(budget // 2, 256 * 1024))
        while (outer // to) * (inner // ti) < _MIN_PAR_STEPS:
            cand_to = _largest_divisor(outer, to // 2, sm) if to > sm else None
            if cand_to and cand_to * tr * ti * isz >= min_block:
                to = cand_to
                continue
            cand_ti = _largest_divisor(inner, ti // 2, 128) if ti > 128 else None
            if cand_ti and to * tr * cand_ti * isz >= min_block:
                ti = cand_ti
                continue
            break

    r_tiles = R // tr
    in_bufs = 3 if (r_tiles > 1 and to * tr * ti * isz < 1024 * 1024) else 2

    est = (in_bufs * to * tr * ti * isz            # pipelined input blocks
           + 2 * to * ti * isz                     # double-buffered output blocks
           + (to * ti * 4 if r_tiles > 1 else 0))  # f32 accumulator scratch
    if est + 8 * 1024 * 1024 > hw.hard_cap:
        return None                                # defer to XLA rather than VMEM-OOM
    vmem_limit = int(min(hw.hard_cap, max(32 * 1024 * 1024, est + 8 * 1024 * 1024)))

    inv_n = 1.0 / R
    grid_oi = (outer // to, inner // ti)

    if r_tiles == 1:
        kernel = functools.partial(_mean_mid_full_r_kernel, inv_n)
        grid = grid_oi
        in_specs = [pl.BlockSpec((to, tr, ti), lambda i, j: (i, 0, j))]
        out_specs = pl.BlockSpec((to, ti), lambda i, j: (i, j))
        scratch = []
        sem = ("parallel", "parallel")
    else:
        kernel = functools.partial(_mean_mid_tiled_r_kernel, inv_n)
        grid = grid_oi + (r_tiles,)                # reduction axis last
        in_specs = [_maybe_buffered_spec((to, tr, ti), lambda i, j, k: (i, k, j), in_bufs)]
        out_specs = pl.BlockSpec((to, ti), lambda i, j, k: (i, j))
        scratch = [pltpu.VMEM((to, ti), jnp.float32)]
        sem = ("parallel", "parallel", "arbitrary")

    return pl.pallas_call(
        kernel,
        out_shape=jax.ShapeDtypeStruct((outer, inner), dt),
        grid_spec=pltpu.PrefetchScalarGridSpec(
            num_scalar_prefetch=0,
            grid=grid,
            in_specs=in_specs,
            out_specs=out_specs,
            scratch_shapes=scratch,
        ),
        compiler_params=pltpu.CompilerParams(
            dimension_semantics=sem,
            vmem_limit_bytes=vmem_limit,
        ),
    )(x3)


def _mean_last_axis(x2, budget, hw):
    """Mean over the last axis of x2 = (outer, R). Returns (outer,) or None."""
    outer, R = x2.shape
    dt = x2.dtype
    isz = dt.itemsize
    sm = _sublane_multiple(dt)

    # Factor outer = G * L so the output block is lane-dense (L multiple of 128
    # when possible).
    # TODO(synk): for L < 128 (outer with no x128 factor) the store is masked;
    # a wrapper-side repack to a >=128-wide slab is possible but not done here.
    L = (_largest_divisor(outer, 512, 128)
         or _largest_divisor(outer, 512, 8)
         or _largest_divisor(outer, min(outer, 512), 1))
    G = outer // L
    tg_floor = _min_valid_tile(G, sm)

    # Reduce tile along R (the lane axis of the input block): full R when it
    # fits, else a x128 divisor + f32 accumulator over the last grid axis.
    r_cap = max(128, budget // (isz * L * min(tg_floor, sm)))
    if R <= r_cap:
        tr = R
    else:
        tr = _largest_divisor(R, r_cap, 128) or R

    # Outer-group tile: fill the remaining budget.
    g_cap = max(1, budget // (isz * L * tr))
    tg = G if G <= g_cap else _aligned_tile(G, g_cap, sm)

    # Minimum parallel step count on the G axis for medium/large inputs.
    total_bytes = outer * R * isz
    if total_bytes >= _MIN_SPLIT_BYTES:
        min_block = max(32 * 1024, min(budget // 2, 256 * 1024))
        while G // tg < _MIN_PAR_STEPS:
            cand_tg = _largest_divisor(G, tg // 2, sm) if tg > sm else None
            if cand_tg and cand_tg * L * tr * isz >= min_block:
                tg = cand_tg
                continue
            break

    r_tiles = R // tr
    in_bufs = 3 if (r_tiles > 1 and tg * L * tr * isz < 1024 * 1024) else 2

    est = (in_bufs * tg * L * tr * isz
           + 2 * tg * L * isz
           + (tg * L * 4 if r_tiles > 1 else 0))
    if est + 8 * 1024 * 1024 > hw.hard_cap:
        return None
    vmem_limit = int(min(hw.hard_cap, max(32 * 1024 * 1024, est + 8 * 1024 * 1024)))

    inv_n = 1.0 / R
    x3 = x2.reshape(G, L, R)

    if r_tiles == 1:
        kernel = functools.partial(_mean_last_full_r_kernel, inv_n)
        grid = (G // tg,)
        in_specs = [pl.BlockSpec((tg, L, R), lambda g: (g, 0, 0))]
        out_specs = pl.BlockSpec((tg, L), lambda g: (g, 0))
        scratch = []
        sem = ("parallel",)
    else:
        kernel = functools.partial(_mean_last_tiled_r_kernel, inv_n)
        grid = (G // tg, r_tiles)                  # reduction axis last
        in_specs = [_maybe_buffered_spec((tg, L, tr), lambda g, k: (g, 0, k), in_bufs)]
        out_specs = pl.BlockSpec((tg, L), lambda g, k: (g, 0))
        scratch = [pltpu.VMEM((tg, L), jnp.float32)]
        sem = ("parallel", "arbitrary")

    out = pl.pallas_call(
        kernel,
        out_shape=jax.ShapeDtypeStruct((G, L), dt),
        grid_spec=pltpu.PrefetchScalarGridSpec(
            num_scalar_prefetch=0,
            grid=grid,
            in_specs=in_specs,
            out_specs=out_specs,
            scratch_shapes=scratch,
        ),
        compiler_params=pltpu.CompilerParams(
            dimension_semantics=sem,
            vmem_limit_bytes=vmem_limit,
        ),
    )(x3)
    return out.reshape(outer)


# --------------------------------------------------------------------------
# Public wrapper (torch.Tensor.mean(dim, keepdim) equivalent)
# --------------------------------------------------------------------------
@functools.partial(
    jax.jit,
    static_argnums=(1, 2),
    static_argnames=("force_pallas", "block_budget_bytes"),
)
def mean_pallas(x, dim, keep_dim=False, *, force_pallas=False, block_budget_bytes=None):
    shape = x.shape
    ndim = len(shape)
    if ndim == 0:
        return jnp.mean(x)
    dim = dim % ndim

    R = shape[dim]
    outer = math.prod(shape[:dim])
    inner = math.prod(shape[dim + 1:])
    out_shape = shape[:dim] + ((1,) if keep_dim else ()) + shape[dim + 1:]

    hw = _hw()
    budget = int(block_budget_bytes) if block_budget_bytes else hw.block_budget

    # Degenerate / empty extents: defer to XLA (R == 0 would otherwise divide by zero;
    # jnp.mean matches torch's NaN behavior on an empty reduced dim).
    if R == 0 or outer == 0 or inner == 0:
        return jnp.mean(x, axis=dim, keepdims=keep_dim)

    # Small-input fast path: launch + per-step overhead dominates; XLA's fused
    # reduce is strictly faster below the generation-aware crossover.
    if x.size * x.dtype.itemsize < hw.small_input_bytes and not force_pallas:
        return jnp.mean(x, axis=dim, keepdims=keep_dim)

    if inner == 1:
        out2 = _mean_last_axis(x.reshape(outer, R), budget, hw)
    else:
        out2 = _mean_middle_axis(x.reshape(outer, R, inner), budget, hw)

    if out2 is None:
        # TODO(synk): pathological extents with no VMEM-sized aligned tiling; defer to XLA.
        return jnp.mean(x, axis=dim, keepdims=keep_dim)

    return out2.reshape(out_shape)


class Mean:
    """Drop-in analogue of the PyTorch Mean module."""

    def __init__(self, dim, keep_dim=False):
        self.dim = dim
        self.keep_dim = keep_dim

    def __call__(self, x, **kw):
        return mean_pallas(x, self.dim, self.keep_dim, **kw)


if __name__ == "__main__":
    key = jax.random.PRNGKey(0)
    # Small NCHW input, consistent with typical Conv2d feature maps.
    x = jax.random.normal(key, (2, 4, 16, 16), dtype=jnp.float32)

    # dim=1 (channel mean): middle-axis path, single full-R block.
    out = jax.block_until_ready(mean_pallas(x, 1, False, force_pallas=True))
    ref = jnp.mean(x, axis=1)
    assert out.shape == ref.shape, (out.shape, ref.shape)
    assert jnp.allclose(out, ref, atol=1e-5, rtol=1e-5)

    # keep_dim=True path.
    out_kd = jax.block_until_ready(mean_pallas(x, 2, True, force_pallas=True))
    ref_kd = jnp.mean(x, axis=2, keepdims=True)
    assert out_kd.shape == ref_kd.shape
    assert jnp.allclose(out_kd, ref_kd, atol=1e-5, rtol=1e-5)

    # Last-axis reduction: lane-dense output path (full R per block).
    out_last = jax.block_until_ready(mean_pallas(x, 3, False, force_pallas=True))
    ref_last = jnp.mean(x, axis=3)
    assert out_last.shape == ref_last.shape
    assert jnp.allclose(out_last, ref_last, atol=1e-5, rtol=1e-5)

    # Middle-axis tiled-reduction (accumulator + deeper buffering) kernel.
    xb = jax.random.normal(jax.random.PRNGKey(0), (2, 256, 8, 128), dtype=jnp.float32)
    out_b = jax.block_until_ready(
        mean_pallas(xb, 1, False, force_pallas=True, block_budget_bytes=32 * 1024))
    ref_b = jnp.mean(xb, axis=1)
    assert out_b.shape == ref_b.shape
    assert jnp.allclose(out_b, ref_b, atol=1e-4, rtol=1e-4)

    # Medium input with default budget: exercises the min-parallel-steps split.
    xm = jax.random.normal(jax.random.PRNGKey(1), (4, 64, 16, 128), dtype=jnp.float32)
    out_m2 = jax.block_until_ready(mean_pallas(xm, 1, False, force_pallas=True))
    ref_m2 = jnp.mean(xm, axis=1)
    assert out_m2.shape == ref_m2.shape
    assert jnp.allclose(out_m2, ref_m2, atol=1e-4, rtol=1e-4)

    # Last-axis R-tiled accumulator kernel (long reduction, small budget).
    xl = jax.random.normal(jax.random.PRNGKey(2), (256, 2048), dtype=jnp.float32)
    out_l = jax.block_until_ready(
        mean_pallas(xl, 1, False, force_pallas=True, block_budget_bytes=128 * 1024))
    ref_l = jnp.mean(xl, axis=1)
    assert out_l.shape == ref_l.shape
    assert jnp.allclose(out_l, ref_l, atol=1e-4, rtol=1e-4)

    # bf16 path: dtype-aware sublane multiples + f32 accumulation.
    xbf = jax.random.normal(jax.random.PRNGKey(3), (4, 16, 8, 128), dtype=jnp.bfloat16)
    out_bf = jax.block_until_ready(mean_pallas(xbf, 1, False, force_pallas=True))
    ref_bf = jnp.mean(xbf.astype(jnp.float32), axis=1)
    assert out_bf.shape == ref_bf.shape
    assert jnp.allclose(out_bf.astype(jnp.float32), ref_bf, atol=5e-2, rtol=2e-2)

    # Module-style usage + small-input fallback (plain jnp.mean) path.
    m = Mean(dim=1)
    out_mod = jax.block_until_ready(m(x))
    assert jnp.allclose(out_mod, ref, atol=1e-5, rtol=1e-5)

    print("KERNEL_OK")
</pallas_src>

<mosaic_0001>
module attributes {stable_mosaic.version = 11 : i64} {
  func.func @_mean_mid_full_r_kernel(%arg0: i32, %arg1: i32, %arg2: memref<2x4x256xf32, #tpu.memory_space<vmem>>, %arg3: memref<2x256xf32, #tpu.memory_space<vmem>>) attributes {dimension_semantics = [#tpu.dimension_semantics<parallel>, #tpu.dimension_semantics<parallel>], iteration_bounds = array<i64: 1, 1>, scalar_prefetch = 0 : i64, scratch_operands = 0 : i64, tpu.core_type = #tpu.core_type<tc>, window_params = [{transform_indices = @transform_0, window_bounds = array<i64: 2, 4, 256>}, {transform_indices = @transform_1, window_bounds = array<i64: 2, 256>}]} {
    %c0 = arith.constant 0 : index
    %c0_0 = arith.constant 0 : index
    %c0_1 = arith.constant 0 : index
    %0 = vector.load %arg2[%c0, %c0_0, %c0_1] : memref<2x4x256xf32, #tpu.memory_space<vmem>>, vector<2x4x256xf32>
    %cst = arith.constant dense<0.000000e+00> : vector<2x256xf32>
    %1 = vector.multi_reduction <add>, %0, %cst [1] : vector<2x4x256xf32> to vector<2x256xf32>
    %cst_2 = arith.constant 2.500000e-01 : f32
    %2 = vector.broadcast %cst_2 : f32 to vector<2x256xf32>
    %3 = arith.mulf %1, %2 : vector<2x256xf32>
    %c0_3 = arith.constant 0 : index
    %c0_4 = arith.constant 0 : index
    %4 = vector.load %arg3[%c0_3, %c0_4] : memref<2x256xf32, #tpu.memory_space<vmem>>, vector<2x256xf32>
    tpu.vector_store %arg3[%c0_3, %c0_4], %3 {strides = array<i32>} : memref<2x256xf32, #tpu.memory_space<vmem>>, vector<2x256xf32>,
    return
  }
  func.func @transform_0(%arg0: i32, %arg1: i32) -> (i32, i32, i32) {
    %c0_i32 = arith.constant 0 : i32
    %c0_i32_0 = arith.constant 0 : i32
    return %arg0, %c0_i32, %arg1 : i32, i32, i32
  }
  func.func @transform_1(%arg0: i32, %arg1: i32) -> (i32, i32) {
    %c0_i32 = arith.constant 0 : i32
    return %arg0, %arg1 : i32, i32
  }
}

</mosaic_0001>

<bundles_post_ra>
// kernel: mean_pallas.1
= control target key start
LH: loop header
LB: loop body
LE: loop exit
PB: predicated region body
PF: predicated region fallthrough
CT: control target
= control target key end

     0   :  { %vm16_vm0 = vcmask 1043456   ;;  %v91_v18 = vmov 1983009808   ;;  %v57_v20 = vlaneseq  ;;  %vm74_vm1 = vcmask 1041409   ;;  %s111_s0 = inlined_call_operand.vmem [shape: f32[2,4,256], index: 0, kind: input, shape index: {}]   ;;  %s112_s1 = inlined_call_operand.vmem [shape: f32[2,256], index: 1, kind: output, shape index: {}]  }
   0x1   :  { %v8_v0 = vld [vmem:[%s111_s0] sm:$0xff]  ;;  %v9_v1 = vld [vmem:[%s111_s0 + $0x8] sm:$0xff]  ;;  %v55_v19 = vunpack.c.l.s4 %v91_v18  ;;  %vm76_vm2 = vcmask 1043459   ;;  %vm78_vm3 = vcmask 1045509   ;;  %vm80_vm4 = vcmask 1047559  }
   0x2   :  { %v12_v2 = vcombine.high %v8_v0, %v8_v0  ;;  %v13_v3 = vcombine.high %v9_v1, %v9_v1  ;;  %v17_v4 = vsel %vm16_vm0, %v8_v0, 0.0  ;;  %v31_v5 = vsel %vm16_vm0, %v9_v1, 0.0 }
   0x3   :  { %v18_v6 = vrot.slane %v17_v4, 4  ;;  %v32_v7 = vrot.slane %v31_v5, 4  ;;  %v56_v29 = vunpack.c.0.s8 %v55_v19  ;;  %v58_v30 = vshrl.u32 %v57_v20, 7 }
   0x4   :  { %v24_v8 = vsel %vm16_vm0, %v12_v2, 0.0  ;;  %v38_v9 = vsel %vm16_vm0, %v13_v3, 0.0 }
   0x5   :  { %v19_v10 = vadd.f32 %v18_v6, %v17_v4  ;;  %v25_v11 = vrot.slane %v24_v8, 4  ;;  %v33_v12 = vadd.f32 %v32_v7, %v31_v5  ;;  %v39_v13 = vrot.slane %v38_v9, 4 }
   0x6   :  { %v59_v41 = vsub.s32 %v56_v29, %v58_v30 }
   0x7   :  { %v20_v14 = vrot.slane %v19_v10, 2  ;;  %v26_v15 = vadd.f32 %v25_v11, %v24_v8  ;;  %v34_v16 = vrot.slane %v33_v12, 2  ;;  %v40_v17 = vadd.f32 %v39_v13, %v38_v9 }
   0x9   :  { %v21_v21 = vadd.f32 %v20_v14, %v19_v10  ;;  %v27_v22 = vrot.slane %v26_v15, 2  ;;  %v35_v23 = vadd.f32 %v34_v16, %v33_v12  ;;  %v41_v24 = vrot.slane %v40_v17, 2 }
   0xb   :  { %v22_v25 = vrot.slane %v21_v21, 1  ;;  %v28_v26 = vadd.f32 %v27_v22, %v26_v15  ;;  %v36_v27 = vrot.slane %v35_v23, 1  ;;  %v42_v28 = vadd.f32 %v41_v24, %v40_v17 }
   0xd   :  { %v23_v31 = vadd.f32 %v22_v25, %v21_v21  ;;  %v29_v32 = vrot.slane %v28_v26, 1  ;;  %v37_v33 = vadd.f32 %v36_v27, %v35_v23  ;;  %v43_v34 = vrot.slane %v42_v28, 1 }
   0xf   :  { %v30_v35 = vadd.f32 %v29_v32, %v28_v26  ;;  %v44_v36 = vadd.f32 %v43_v34, %v42_v28  ;;  %v45_v37 = vmul.f32 0.25, %v23_v31  ;;  %v47_v38 = vmul.f32 0.25, %v37_v33 }
  0x11   :  { %v46_v39 = vmul.f32 0.25, %v30_v35  ;;  %v48_v40 = vmul.f32 0.25, %v44_v36 }
  0x13   :  { %v53_v42 = vcombine.low %v45_v37, %v46_v39  ;;  %v61_v43 = vcombine.low %v47_v38, %v48_v40 }
  0x15   :  { %v60_v44 = vrot.slane %v53_v42, %v59_v41  ;;  %v68_v45 = vrot.slane %v61_v43, %v59_v41 }
  0x17   :  { %v73_v46 = vrot.slane %v68_v45, 7 }
  0x19   :  { %v75_v47 = vsel %vm74_vm1, %v73_v46, %v60_v44 }
  0x1a   :  { %v77_v48 = vsel %vm76_vm2, %v73_v46, %v75_v47 }
  0x1b   :  { %v79_v49 = vsel %vm78_vm3, %v73_v46, %v77_v48 }
  0x1c   :  { %v81_v50 = vsel %vm80_vm4, %v73_v46, %v79_v49 }
  0x1d   :  { %83 = vst [vmem:[%s112_s1] sm:$0xf] %v81_v50 }

</bundles_post_ra>
